<compile_context>
chip_gen: v6e
topology: v6e:2x2x1
jax: 0.10.0
libtpu: 0.0.40
codegen_flags: <defaults>
</compile_context>

<pallas_src>
import jax
import jax.numpy as jnp
from jax.experimental import pallas as pl
from jax.experimental.pallas import tpu as pltpu


def _round_up(x: int, m: int) -> int:
    return ((x + m - 1) // m) * m


def _choose_packed_tile(bp: int, max_packed_rows: int) -> int:
    """Packed-row tile: full extent for tiny batches, else >= 2 blocks, mult-of-8."""
    if bp <= 8:
        return bp  # single full-extent block (block == full array dim, always legal)
    # At least 2 grid blocks so v7x's two TensorCores both get work.
    return min(max(8, max_packed_rows), _round_up(pl.cdiv(bp, 2), 8))


def _mlp_kernel(x_ref, w1_ref, b1_ref, w2_ref, b2_ref, o_ref):
    # Biases read exactly once (hoisted; no broadcast re-materialization).
    b1 = b1_ref[...]                                   # f32 [1, P*hidden]
    b2 = b2_ref[...]                                   # f32 [1, P*out]

    # x arrives in its native dtype; cast to the MXU feed dtype in VMEM
    # (VPU cast hides under the DMA) instead of an extra wrapper HBM pass.
    x = x_ref[...].astype(w1_ref.dtype)                # [TBp, P*in]

    # Layer 1: MXU matmul, f32 accumulation; f32 bias + tanh (lane-dense).
    h = jnp.dot(x, w1_ref[...], preferred_element_type=jnp.float32) + b1
    h = jnp.tanh(h)                                    # [TBp, P*hidden], 100% live lanes
    # Layer 2.
    y = jnp.dot(h.astype(w2_ref.dtype), w2_ref[...],
                preferred_element_type=jnp.float32) + b2
    o_ref[...] = jnp.tanh(y).astype(o_ref.dtype)       # lane-dense (128-wide) store


def _fold_and_pack_params(w1a, b1a, w1b, b1b, w2a, b2a, w2b, b2b,
                          *, pack, mxu_dtype):
    """Fold each LinearWithSubmodule into one dense layer, then block-diag pack."""
    hidden = w1a.shape[0]
    out_features = w2a.shape[0]

    # Exact fold: W = [Wa | Wb] (concat along input dim), b = ba + bb.
    w1 = jnp.concatenate([w1a, w1b], axis=1).T.astype(jnp.float32)   # [in, hidden]
    w2 = jnp.concatenate([w2a, w2b], axis=1).T.astype(jnp.float32)   # [hidden, out]
    b1 = (b1a + b1b).astype(jnp.float32)                              # [hidden]
    b2 = (b2a + b2b).astype(jnp.float32)                              # [out]

    # Row-packing: `pack` consecutive rows share one packed row of lanes, with
    # block-diagonal weights so the packed matmul is data-identical per row.
    eye = jnp.eye(pack, dtype=jnp.float32)
    w1p = jnp.kron(eye, w1).astype(mxu_dtype)          # [P*in,  P*hidden]
    w2p = jnp.kron(eye, w2).astype(mxu_dtype)          # [P*hidden, P*out]
    b1p = jnp.tile(b1, pack).reshape(1, pack * hidden)           # f32 [1, P*hidden]
    b2p = jnp.tile(b2, pack).reshape(1, pack * out_features)     # f32 [1, P*out]
    return w1p, b1p, w2p, b2p


def _forward_packed(x, w1p, b1p, w2p, b2p, *, pack, out_features,
                    max_block_rows, out_dtype):
    B, in_features = x.shape
    p_in = pack * in_features
    p_hid = w1p.shape[1]
    p_out = pack * out_features

    # Pad the batch to a multiple of the packing factor; padded rows flow
    # through dot/tanh (bounded values) and are sliced off afterwards.
    b_pad = _round_up(max(B, 1), pack)
    if b_pad != B:
        x = jnp.pad(x, ((0, b_pad - B), (0, 0)))
    bp = b_pad // pack
    xp = x.reshape(bp, p_in)            # row-major reshape -> lane-dense, data-identical

    tbp = _choose_packed_tile(bp, max(8, max_block_rows // pack))
    grid = (pl.cdiv(bp, tbp),)

    feed_bytes = jnp.dtype(w1p.dtype).itemsize
    cost = pl.CostEstimate(
        flops=2 * bp * (p_in * p_hid + p_hid * p_out),
        transcendentals=bp * (p_hid + p_out),
        bytes_accessed=(
            xp.size * jnp.dtype(x.dtype).itemsize
            + (w1p.size + w2p.size) * feed_bytes
            + (b1p.size + b2p.size) * 4
            + bp * p_out * jnp.dtype(out_dtype).itemsize
        ),
    )

    resident = lambda shape: pl.BlockSpec(shape, lambda i: (0, 0))

    out_p = pl.pallas_call(
        _mlp_kernel,
        out_shape=jax.ShapeDtypeStruct((bp, p_out), out_dtype),
        grid_spec=pltpu.PrefetchScalarGridSpec(
            num_scalar_prefetch=0,
            grid=grid,
            in_specs=[
                pl.BlockSpec((tbp, p_in), lambda i: (i, 0)),   # streamed x tiles
                resident(w1p.shape),                           # W1p resident in VMEM
                resident(b1p.shape),                           # b1 resident
                resident(w2p.shape),                           # W2p resident
                resident(b2p.shape),                           # b2 resident
            ],
            out_specs=pl.BlockSpec((tbp, p_out), lambda i: (i, 0)),
        ),
        compiler_params=pltpu.CompilerParams(
            dimension_semantics=("parallel",),   # batch blocks shard across v7x's 2 TCs
        ),
        cost_estimate=cost,
    )(xp, w1p, b1p, w2p, b2p)

    # Row-major unpack back to [B, out]; data-identical to the packed layout.
    return out_p.reshape(b_pad, out_features)[:B]


def make_basic_linear_net_with_submodule(
        w1a, b1a, w1b, b1b, w2a, b2a, w2b, b2b,
        *, mxu_dtype=jnp.bfloat16, pack=8, max_block_rows=8192, out_dtype=None):
    """Fold + pack the module parameters ONCE; return a jitted forward(x).

    Weight layout follows PyTorch nn.Linear: w1a/w1b [hidden, in/2], b1a/b1b
    [hidden], w2a/w2b [out, hidden/2], b2a/b2b [out].  Row-packing (pack=8) is
    intended for small feature dims (<128 lanes), which is this module's regime.
    """
    out_features = w2a.shape[0]
    w1p, b1p, w2p, b2p = _fold_and_pack_params(
        w1a, b1a, w1b, b1b, w2a, b2a, w2b, b2b, pack=pack, mxu_dtype=mxu_dtype)

    @jax.jit
    def forward(x):
        return _forward_packed(
            x, w1p, b1p, w2p, b2p, pack=pack, out_features=out_features,
            max_block_rows=max_block_rows,
            out_dtype=(x.dtype if out_dtype is None else out_dtype))

    return forward


def basic_linear_net_with_submodule(x, w1a, b1a, w1b, b1b, w2a, b2a, w2b, b2b, **kw):
    """Convenience one-shot wrapper (prefer the factory for repeated calls)."""
    return make_basic_linear_net_with_submodule(
        w1a, b1a, w1b, b1b, w2a, b2a, w2b, b2b, **kw)(x)


if __name__ == "__main__":
    # Small shapes consistent with the module: [batch, in_features].
    batch, in_features, hidden_nodes, out_features = 8, 32, 64, 16
    in1 = in_features // 2
    in2 = in_features - in1
    h1 = hidden_nodes // 2
    h2 = hidden_nodes - h1

    key = jax.random.PRNGKey(0)
    k1, k2, k3, k4, kx, kx2 = jax.random.split(key, 6)

    def linear_init(k, fan_in, fan_out):
        # mimics nn.Linear uniform(-1/sqrt(fan_in), 1/sqrt(fan_in)); weight [out, in]
        kw, kb = jax.random.split(k)
        bound = 1.0 / jnp.sqrt(fan_in)
        w = jax.random.uniform(kw, (fan_out, fan_in), jnp.float32, -bound, bound)
        b = jax.random.uniform(kb, (fan_out,), jnp.float32, -bound, bound)
        return w, b

    w1a, b1a = linear_init(k1, in1, hidden_nodes)   # linear1.linear1
    w1b, b1b = linear_init(k2, in2, hidden_nodes)   # linear1.linear2
    w2a, b2a = linear_init(k3, h1, out_features)    # linear2.linear1
    w2b, b2b = linear_init(k4, h2, out_features)    # linear2.linear2

    x_small = jax.random.normal(kx, (batch, in_features), jnp.float32)
    x_big = jax.random.normal(kx2, (203, in_features), jnp.float32)  # pad + 2-block grid

    # Plain-JAX reference mirroring the PyTorch module exactly (split submodules).
    def ref_forward(xv):
        h = jnp.tanh(xv[:, :in1] @ w1a.T + b1a + xv[:, in1:] @ w1b.T + b1b)
        return jnp.tanh(h[:, :h1] @ w2a.T + b2a + h[:, h1:] @ w2b.T + b2b)

    # 1) exact-f32 MXU feeds: must match module semantics tightly.
    fwd_f32 = make_basic_linear_net_with_submodule(
        w1a, b1a, w1b, b1b, w2a, b2a, w2b, b2b, mxu_dtype=jnp.float32)
    # 2) default bf16 MXU feeds (perf path, f32 accumulation): bf16-level tolerance.
    fwd_bf16 = make_basic_linear_net_with_submodule(
        w1a, b1a, w1b, b1b, w2a, b2a, w2b, b2b)

    for xv in (x_small, x_big):
        ref = ref_forward(xv)

        out_f32 = fwd_f32(xv)
        jax.block_until_ready(out_f32)
        assert out_f32.shape == (xv.shape[0], out_features)
        assert jnp.allclose(out_f32, ref, atol=1e-4, rtol=1e-4)

        out_bf16 = fwd_bf16(xv)
        jax.block_until_ready(out_bf16)
        assert out_bf16.shape == (xv.shape[0], out_features)
        assert jnp.allclose(out_bf16, ref, atol=3e-2, rtol=3e-2)

    print("KERNEL_OK")
</pallas_src>

<mosaic_0001>
module attributes {stable_mosaic.version = 11 : i64} {
  func.func @_mlp_kernel(%arg0: i32, %arg1: memref<1x256xf32, #tpu.memory_space<vmem>>, %arg2: memref<256x512xf32, #tpu.memory_space<vmem>>, %arg3: memref<1x512xf32, #tpu.memory_space<vmem>>, %arg4: memref<512x128xf32, #tpu.memory_space<vmem>>, %arg5: memref<1x128xf32, #tpu.memory_space<vmem>>, %arg6: memref<1x128xf32, #tpu.memory_space<vmem>>) attributes {dimension_semantics = [#tpu.dimension_semantics<parallel>], iteration_bounds = array<i64: 1>, scalar_prefetch = 0 : i64, scratch_operands = 0 : i64, tpu.core_type = #tpu.core_type<tc>, window_params = [{transform_indices = @transform_0, window_bounds = array<i64: 1, 256>}, {pipeline_mode = #tpu.pipeline_mode<synchronous>, transform_indices = @transform_1, window_bounds = array<i64: 256, 512>}, {pipeline_mode = #tpu.pipeline_mode<synchronous>, transform_indices = @transform_2, window_bounds = array<i64: 1, 512>}, {pipeline_mode = #tpu.pipeline_mode<synchronous>, transform_indices = @transform_3, window_bounds = array<i64: 512, 128>}, {pipeline_mode = #tpu.pipeline_mode<synchronous>, transform_indices = @transform_4, window_bounds = array<i64: 1, 128>}, {transform_indices = @transform_5, window_bounds = array<i64: 1, 128>}]} {
    %c0 = arith.constant 0 : index
    %c0_0 = arith.constant 0 : index
    %0 = vector.load %arg3[%c0, %c0_0] : memref<1x512xf32, #tpu.memory_space<vmem>>, vector<1x512xf32>
    %c0_1 = arith.constant 0 : index
    %c0_2 = arith.constant 0 : index
    %1 = vector.load %arg5[%c0_1, %c0_2] : memref<1x128xf32, #tpu.memory_space<vmem>>, vector<1x128xf32>
    %c0_3 = arith.constant 0 : index
    %c0_4 = arith.constant 0 : index
    %2 = vector.load %arg1[%c0_3, %c0_4] : memref<1x256xf32, #tpu.memory_space<vmem>>, vector<1x256xf32>
    %c0_5 = arith.constant 0 : index
    %c0_6 = arith.constant 0 : index
    %3 = vector.load %arg2[%c0_5, %c0_6] : memref<256x512xf32, #tpu.memory_space<vmem>>, vector<256x512xf32>
    %cst = arith.constant dense<0.000000e+00> : vector<1x512xf32>
    %4 = tpu.matmul %2, %3, %cst {dimension_numbers = #tpu.dot_dimension_numbers<[1], [0], [0], [1], [0, 0, 1, 1], [], []>} : vector<1x256xf32>, vector<256x512xf32>, vector<1x512xf32> -> vector<1x512xf32>
    %5 = arith.addf %4, %0 : vector<1x512xf32>
    %6 = math.tanh %5 : vector<1x512xf32>
    %c0_7 = arith.constant 0 : index
    %c0_8 = arith.constant 0 : index
    %7 = vector.load %arg4[%c0_7, %c0_8] : memref<512x128xf32, #tpu.memory_space<vmem>>, vector<512x128xf32>
    %cst_9 = arith.constant dense<0.000000e+00> : vector<1x128xf32>
    %8 = tpu.matmul %6, %7, %cst_9 {dimension_numbers = #tpu.dot_dimension_numbers<[1], [0], [0], [1], [0, 0, 1, 1], [], []>} : vector<1x512xf32>, vector<512x128xf32>, vector<1x128xf32> -> vector<1x128xf32>
    %9 = arith.addf %8, %1 : vector<1x128xf32>
    %10 = math.tanh %9 : vector<1x128xf32>
    %c0_10 = arith.constant 0 : index
    %c0_11 = arith.constant 0 : index
    %11 = vector.load %arg6[%c0_10, %c0_11] : memref<1x128xf32, #tpu.memory_space<vmem>>, vector<1x128xf32>
    tpu.vector_store %arg6[%c0_10, %c0_11], %10 {strides = array<i32>} : memref<1x128xf32, #tpu.memory_space<vmem>>, vector<1x128xf32>,
    return
  }
  func.func @transform_0(%arg0: i32) -> (i32, i32) {
    %c0_i32 = arith.constant 0 : i32
    %c0_i32_0 = arith.constant 0 : i32
    return %arg0, %c0_i32 : i32, i32
  }
  func.func @transform_1(%arg0: i32) -> (i32, i32) {
    %c0_i32 = arith.constant 0 : i32
    %c0_i32_0 = arith.constant 0 : i32
    %c0_i32_1 = arith.constant 0 : i32
    return %c0_i32, %c0_i32_0 : i32, i32
  }
  func.func @transform_2(%arg0: i32) -> (i32, i32) {
    %c0_i32 = arith.constant 0 : i32
    %c0_i32_0 = arith.constant 0 : i32
    %c0_i32_1 = arith.constant 0 : i32
    return %c0_i32, %c0_i32_0 : i32, i32
  }
  func.func @transform_3(%arg0: i32) -> (i32, i32) {
    %c0_i32 = arith.constant 0 : i32
    %c0_i32_0 = arith.constant 0 : i32
    %c0_i32_1 = arith.constant 0 : i32
    return %c0_i32, %c0_i32_0 : i32, i32
  }
  func.func @transform_4(%arg0: i32) -> (i32, i32) {
    %c0_i32 = arith.constant 0 : i32
    %c0_i32_0 = arith.constant 0 : i32
    %c0_i32_1 = arith.constant 0 : i32
    return %c0_i32, %c0_i32_0 : i32, i32
  }
  func.func @transform_5(%arg0: i32) -> (i32, i32) {
    %c0_i32 = arith.constant 0 : i32
    %c0_i32_0 = arith.constant 0 : i32
    return %arg0, %c0_i32 : i32, i32
  }
}

</mosaic_0001>

<bundles_post_ra>
// kernel: forward.1
= control target key start
LH: loop header
LB: loop body
LE: loop exit
PB: predicated region body
PF: predicated region fallthrough
CT: control target
= control target key end

     0   :  { %10 = vsyncpa [#allocation3], 0  ;;  %s767_s0 = inlined_call_operand.vmem [shape: f32[1,256], index: 0, kind: input, shape index: {}]   ;;  %s768_s1 = inlined_call_operand.hbm [shape: f32[256,512], index: 1, kind: input, shape index: {}]   ;;  %s769_s2 = inlined_call_operand.vmem [shape: f32[1,512], index: 2, kind: input, shape index: {}]   ;;  %s770_s3 = inlined_call_operand.hbm [shape: f32[512,128], index: 3, kind: input, shape index: {}]   ;;  %s771_s4 = inlined_call_operand.vmem [shape: f32[1,128], index: 4, kind: input, shape index: {}]   ;;  %s772_s5 = inlined_call_operand.vmem [shape: f32[1,128], index: 5, kind: output, shape index: {}]  }
   0x1   :  { %11 = vsyncpa [#allocation5], 0  ;;  %s699_s18 = smov [#allocation2]  }
   0x2   :  { %s19_s19 = sshll.u32 %s699_s18, 4  ;;  %s20_s19 = int_to_ptr.vmem [resolvable:$true] %s19_s19 }
   0x3   :  { %s663_s20 = scalar_lea.vmem %s20_s19, 16384  ;;  %p668_p1 = scmp.lt.s32.totalorder %s20_s19, %s20_s19 }
   0x4   :  { %p664_p0 = scmp.ne.s32.totalorder %s20_s19, %s663_s20  ;;  %p669_p2 = scmp.lt.s32.totalorder %s663_s20, %s663_s20 }
   0x6   :  { %p670_p3 = por %p669_p2, %p668_p1 }
   0x8   :  { %p671_p4 = pnand %p670_p3, %p664_p0 }
   0xa   :  { %674 = shalt.err (!%p671_p4)
}
   0xb   :  { %s700_s21 = smov 512   ;;  %s701_s22 = smov 32  }
   0xc   :  { %25 = dma.hbm_to_vmem [thread:$0]  %s768_s1, 16384, %s20_s19, [#allocation3], %s700_s21, %s700_s21, %s701_s22  }
   0xd   :  { %s702_s25 = smov [#allocation4]  }
   0xe   :  { %s33_s26 = sshll.u32 %s702_s25, 4  ;;  %s34_s26 = int_to_ptr.vmem [resolvable:$true] %s33_s26 }
   0xf   :  { %s683_s27 = scalar_lea.vmem %s34_s26, 8192  ;;  %p688_p6 = scmp.lt.s32.totalorder %s34_s26, %s34_s26 }
  0x10   :  { %p684_p5 = scmp.ne.s32.totalorder %s34_s26, %s683_s27  ;;  %p689_p7 = scmp.lt.s32.totalorder %s683_s27, %s683_s27 }
  0x12   :  { %p690_p8 = por %p689_p7, %p688_p6 }
  0x14   :  { %p691_p9 = pnand %p690_p8, %p684_p5 }
  0x16   :  { %694 = shalt.err (!%p691_p9)
}
  0x17   :  { %s703_s28 = smov 128   ;;  %s704_s29 = smov 8  }
  0x18   :  { %39 = dma.hbm_to_vmem [thread:$0]  %s770_s3, 8192, %s34_s26, [#allocation5], %s703_s28, %s703_s28, %s704_s29  }
  0x19   :  { %695 = dma.done.wait [#allocation3], 16384  }
  0x1a   :  { %696 = vsyncadd [#allocation3], 4294950912 }
  0x1b   :  { %697 = dma.done.wait [#allocation5], 8192  }
  0x1c   :  { %698 = vsyncadd [#allocation5], 4294959104  ;;  %v112_v0 = vld [vmem:[#allocation2 + $0x1e8] sm:$0xff]  ;;  %v114_v1 = vld [vmem:[#allocation2 + $0x1f8] sm:$0xff] }
  0x1d   :  { %v111_v2 = vld [vmem:[#allocation2 + $0x1e0] sm:$0xff]  ;;  %211 = vmatprep.subr.mxu0 %v112_v0  ;;  %282 = vmatprep.subr.mxu1 %v114_v1  ;;  %v113_v3 = vld [vmem:[#allocation2 + $0x1f0] sm:$0xff]  ;;  %v108_v4 = vld [vmem:[#allocation2 + $0x1c8] sm:$0xff] }
  0x1e   :  { %v110_v5 = vld [vmem:[#allocation2 + $0x1d8] sm:$0xff]  ;;  %212 = vmatpush1.msra.mxu0 %v111_v2  ;;  %283 = vmatpush1.msra.mxu1 %v113_v3  ;;  %v107_v6 = vld [vmem:[#allocation2 + $0x1c0] sm:$0xff]  ;;  %v109_v7 = vld [vmem:[#allocation2 + $0x1d0] sm:$0xff] }
  0x1f   :  { %v104_v8 = vld [vmem:[#allocation2 + $0x1a8] sm:$0xff]  ;;  %213 = vmatprep.subr.mxu0 %v108_v4  ;;  %284 = vmatprep.subr.mxu1 %v110_v5  ;;  %v106_v9 = vld [vmem:[#allocation2 + $0x1b8] sm:$0xff]  ;;  %v103_v10 = vld [vmem:[#allocation2 + $0x1a0] sm:$0xff] }
  0x20   :  { %v105_v11 = vld [vmem:[#allocation2 + $0x1b0] sm:$0xff]  ;;  %214 = vmatpush1.msra.mxu0 %v107_v6  ;;  %285 = vmatpush1.msra.mxu1 %v109_v7  ;;  %v100_v12 = vld [vmem:[#allocation2 + $0x188] sm:$0xff]  ;;  %v102_v13 = vld [vmem:[#allocation2 + $0x198] sm:$0xff] }
  0x21   :  { %215 = vmatprep.subr.mxu0 %v104_v8  ;;  %286 = vmatprep.subr.mxu1 %v106_v9  ;;  %v99_v14 = vld [vmem:[#allocation2 + $0x180] sm:$0xff]  ;;  %v101_v15 = vld [vmem:[#allocation2 + $0x190] sm:$0xff]  ;;  %v96_v16 = vld [vmem:[#allocation2 + $0x168] sm:$0xff] }
  0x22   :  { %216 = vmatpush1.msra.mxu0 %v103_v10  ;;  %287 = vmatpush1.msra.mxu1 %v105_v11  ;;  %v98_v17 = vld [vmem:[#allocation2 + $0x178] sm:$0xff]  ;;  %v95_v18 = vld [vmem:[#allocation2 + $0x160] sm:$0xff]  ;;  %v97_v19 = vld [vmem:[#allocation2 + $0x170] sm:$0xff] }
  0x23   :  { %217 = vmatprep.subr.mxu0 %v100_v12  ;;  %288 = vmatprep.subr.mxu1 %v102_v13  ;;  %v92_v20 = vld [vmem:[#allocation2 + $0x148] sm:$0xff]  ;;  %v94_v21 = vld [vmem:[#allocation2 + $0x158] sm:$0xff]  ;;  %v91_v22 = vld [vmem:[#allocation2 + $0x140] sm:$0xff] }
  0x24   :  { %218 = vmatpush1.msra.mxu0 %v99_v14  ;;  %289 = vmatpush1.msra.mxu1 %v101_v15  ;;  %v93_v23 = vld [vmem:[#allocation2 + $0x150] sm:$0xff]  ;;  %v88_v24 = vld [vmem:[#allocation2 + $0x128] sm:$0xff]  ;;  %v90_v25 = vld [vmem:[#allocation2 + $0x138] sm:$0xff] }
  0x25   :  { %219 = vmatprep.subr.mxu0 %v96_v16  ;;  %290 = vmatprep.subr.mxu1 %v98_v17  ;;  %v87_v26 = vld [vmem:[#allocation2 + $0x120] sm:$0xff]  ;;  %v89_v27 = vld [vmem:[#allocation2 + $0x130] sm:$0xff]  ;;  %v84_v28 = vld [vmem:[#allocation2 + $0x108] sm:$0xff] }
  0x26   :  { %220 = vmatpush1.msra.mxu0 %v95_v18  ;;  %291 = vmatpush1.msra.mxu1 %v97_v19  ;;  %v86_v29 = vld [vmem:[#allocation2 + $0x118] sm:$0xff]  ;;  %v83_v30 = vld [vmem:[#allocation2 + $0x100] sm:$0xff]  ;;  %v85_v31 = vld [vmem:[#allocation2 + $0x110] sm:$0xff] }
  0x27   :  { %221 = vmatprep.subr.mxu0 %v92_v20  ;;  %292 = vmatprep.subr.mxu1 %v94_v21  ;;  %v80_v32 = vld [vmem:[#allocation2 + $0xe8] sm:$0xff]  ;;  %v82_v33 = vld [vmem:[#allocation2 + $0xf8] sm:$0xff]  ;;  %v79_v34 = vld [vmem:[#allocation2 + $0xe0] sm:$0xff] }
  0x28   :  { %222 = vmatpush1.msra.mxu0 %v91_v22  ;;  %293 = vmatpush1.msra.mxu1 %v93_v23  ;;  %v81_v35 = vld [vmem:[#allocation2 + $0xf0] sm:$0xff]  ;;  %v76_v36 = vld [vmem:[#allocation2 + $0xc8] sm:$0xff]  ;;  %v78_v37 = vld [vmem:[#allocation2 + $0xd8] sm:$0xff] }
  0x29   :  { %223 = vmatprep.subr.mxu0 %v88_v24  ;;  %294 = vmatprep.subr.mxu1 %v90_v25  ;;  %v75_v38 = vld [vmem:[#allocation2 + $0xc0] sm:$0xff]  ;;  %v77_v39 = vld [vmem:[#allocation2 + $0xd0] sm:$0xff]  ;;  %v72_v40 = vld [vmem:[#allocation2 + $0xa8] sm:$0xff] }
  0x2a   :  { %224 = vmatpush1.msra.mxu0 %v87_v26  ;;  %295 = vmatpush1.msra.mxu1 %v89_v27  ;;  %v74_v41 = vld [vmem:[#allocation2 + $0xb8] sm:$0xff]  ;;  %v71_v42 = vld [vmem:[#allocation2 + $0xa0] sm:$0xff]  ;;  %v73_v43 = vld [vmem:[#allocation2 + $0xb0] sm:$0xff] }
  0x2b   :  { %225 = vmatprep.subr.mxu0 %v84_v28  ;;  %296 = vmatprep.subr.mxu1 %v86_v29  ;;  %v68_v44 = vld [vmem:[#allocation2 + $0x88] sm:$0xff]  ;;  %v70_v45 = vld [vmem:[#allocation2 + $0x98] sm:$0xff]  ;;  %v67_v46 = vld [vmem:[#allocation2 + $0x80] sm:$0xff] }
  0x2c   :  { %226 = vmatpush1.msra.mxu0 %v83_v30  ;;  %297 = vmatpush1.msra.mxu1 %v85_v31  ;;  %v69_v47 = vld [vmem:[#allocation2 + $0x90] sm:$0xff]  ;;  %v64_v48 = vld [vmem:[#allocation2 + $0x68] sm:$0xff]  ;;  %v66_v49 = vld [vmem:[#allocation2 + $0x78] sm:$0xff] }
  0x2d   :  { %227 = vmatprep.subr.mxu0 %v80_v32  ;;  %298 = vmatprep.subr.mxu1 %v82_v33  ;;  %v63_v50 = vld [vmem:[#allocation2 + $0x60] sm:$0xff]  ;;  %v65_v51 = vld [vmem:[#allocation2 + $0x70] sm:$0xff]  ;;  %v60_v52 = vld [vmem:[#allocation2 + $0x48] sm:$0xff] }
  0x2e   :  { %228 = vmatpush1.msra.mxu0 %v79_v34  ;;  %299 = vmatpush1.msra.mxu1 %v81_v35  ;;  %v62_v53 = vld [vmem:[#allocation2 + $0x58] sm:$0xff]  ;;  %v59_v54 = vld [vmem:[#allocation2 + $0x40] sm:$0xff]  ;;  %v61_v55 = vld [vmem:[#allocation2 + $0x50] sm:$0xff] }
  0x2f   :  { %229 = vmatprep.subr.mxu0 %v76_v36  ;;  %300 = vmatprep.subr.mxu1 %v78_v37  ;;  %v56_v56 = vld [vmem:[#allocation2 + $0x28] sm:$0xff]  ;;  %v58_v57 = vld [vmem:[#allocation2 + $0x38] sm:$0xff]  ;;  %v55_v58 = vld [vmem:[#allocation2 + $0x20] sm:$0xff] }
  0x30   :  { %230 = vmatpush1.msra.mxu0 %v75_v38  ;;  %301 = vmatpush1.msra.mxu1 %v77_v39  ;;  %v57_v59 = vld [vmem:[#allocation2 + $0x30] sm:$0xff]  ;;  %v52_v60 = vld [vmem:[#allocation2 + $0x8] sm:$0xff]  ;;  %v54_v61 = vld [vmem:[#allocation2 + $0x18] sm:$0xff]  ;;  %v180_v38 = vlaneseq }
  0x31   :  { %231 = vmatprep.subr.mxu0 %v72_v40  ;;  %302 = vmatprep.subr.mxu1 %v74_v41  ;;  %v51_v62 = vld [vmem:[#allocation2] sm:$0xff]  ;;  %v53_v63 = vld [vmem:[#allocation2 + $0x10] sm:$0xff]  ;;  %v176_v0 = vld [vmem:[#allocation2 + $0x3e8] sm:$0xff] }
  0x32   :  { %232 = vmatpush1.msra.mxu0 %v71_v42  ;;  %303 = vmatpush1.msra.mxu1 %v73_v43  ;;  %v178_v1 = vld [vmem:[#allocation2 + $0x3f8] sm:$0xff]  ;;  %v175_v2 = vld [vmem:[#allocation2 + $0x3e0] sm:$0xff]  ;;  %v177_v3 = vld [vmem:[#allocation2 + $0x3f0] sm:$0xff] }
  0x33   :  { %233 = vmatprep.subr.mxu0 %v68_v44  ;;  %304 = vmatprep.subr.mxu1 %v70_v45  ;;  %v172_v4 = vld [vmem:[#allocation2 + $0x3c8] sm:$0xff]  ;;  %v174_v5 = vld [vmem:[#allocation2 + $0x3d8] sm:$0xff]  ;;  %v171_v6 = vld [vmem:[#allocation2 + $0x3c0] sm:$0xff] }
  0x34   :  { %234 = vmatpush1.msra.mxu0 %v67_v46  ;;  %305 = vmatpush1.msra.mxu1 %v69_v47  ;;  %v173_v7 = vld [vmem:[#allocation2 + $0x3d0] sm:$0xff]  ;;  %v168_v8 = vld [vmem:[#allocation2 + $0x3a8] sm:$0xff]  ;;  %v170_v9 = vld [vmem:[#allocation2 + $0x3b8] sm:$0xff]  ;;  %v741_v47 = vshrl.u32 %v180_v38, 7 }
  0x35   :  { %235 = vmatprep.subr.mxu0 %v64_v48  ;;  %306 = vmatprep.subr.mxu1 %v66_v49  ;;  %v167_v10 = vld [vmem:[#allocation2 + $0x3a0] sm:$0xff]  ;;  %v169_v11 = vld [vmem:[#allocation2 + $0x3b0] sm:$0xff]  ;;  %v164_v12 = vld [vmem:[#allocation2 + $0x388] sm:$0xff] }
  0x36   :  { %236 = vmatpush1.msra.mxu0 %v63_v50  ;;  %307 = vmatpush1.msra.mxu1 %v65_v51  ;;  %v166_v13 = vld [vmem:[#allocation2 + $0x398] sm:$0xff]  ;;  %v163_v14 = vld [vmem:[#allocation2 + $0x380] sm:$0xff]  ;;  %v165_v15 = vld [vmem:[#allocation2 + $0x390] sm:$0xff] }
  0x37   :  { %237 = vmatprep.subr.mxu0 %v60_v52  ;;  %308 = vmatprep.subr.mxu1 %v62_v53  ;;  %v160_v16 = vld [vmem:[#allocation2 + $0x368] sm:$0xff]  ;;  %v162_v17 = vld [vmem:[#allocation2 + $0x378] sm:$0xff]  ;;  %v159_v18 = vld [vmem:[#allocation2 + $0x360] sm:$0xff] }
  0x38   :  { %238 = vmatpush1.msra.mxu0 %v59_v54  ;;  %309 = vmatpush1.msra.mxu1 %v61_v55  ;;  %v161_v19 = vld [vmem:[#allocation2 + $0x370] sm:$0xff]  ;;  %v156_v20 = vld [vmem:[#allocation2 + $0x348] sm:$0xff]  ;;  %v158_v21 = vld [vmem:[#allocation2 + $0x358] sm:$0xff] }
  0x39   :  { %239 = vmatprep.subr.mxu0 %v56_v56  ;;  %310 = vmatprep.subr.mxu1 %v58_v57  ;;  %v155_v22 = vld [vmem:[#allocation2 + $0x340] sm:$0xff]  ;;  %v157_v23 = vld [vmem:[#allocation2 + $0x350] sm:$0xff]  ;;  %v152_v24 = vld [vmem:[#allocation2 + $0x328] sm:$0xff]  ;;  %v186_v56 = vsub.s32 1, %v741_v47 }
  0x3a   :  { %240 = vmatpush1.msra.mxu0 %v55_v58  ;;  %311 = vmatpush1.msra.mxu1 %v57_v59  ;;  %v154_v25 = vld [vmem:[#allocation2 + $0x338] sm:$0xff]  ;;  %v151_v26 = vld [vmem:[#allocation2 + $0x320] sm:$0xff]  ;;  %v153_v27 = vld [vmem:[#allocation2 + $0x330] sm:$0xff] }
  0x3b   :  { %241 = vmatprep.subr.mxu0 %v52_v60  ;;  %312 = vmatprep.subr.mxu1 %v54_v61  ;;  %v148_v28 = vld [vmem:[#allocation2 + $0x308] sm:$0xff]  ;;  %v150_v29 = vld [vmem:[#allocation2 + $0x318] sm:$0xff]  ;;  %v147_v30 = vld [vmem:[#allocation2 + $0x300] sm:$0xff] }
  0x3c   :  { %242 = vmatpush1.msra.mxu0 %v51_v62  ;;  %313 = vmatpush1.msra.mxu1 %v53_v63  ;;  %v149_v31 = vld [vmem:[#allocation2 + $0x310] sm:$0xff]  ;;  %v144_v32 = vld [vmem:[#allocation2 + $0x2e8] sm:$0xff]  ;;  %v146_v33 = vld [vmem:[#allocation2 + $0x2f8] sm:$0xff]  ;;  %v182_v62 = vsub.s32 0, %v741_v47 }
  0x3d   :  { %243 = vmatprep.subr.mxu0 %v176_v0  ;;  %314 = vmatprep.subr.mxu1 %v178_v1  ;;  %v143_v34 = vld [vmem:[#allocation2 + $0x2e0] sm:$0xff]  ;;  %v145_v35 = vld [vmem:[#allocation2 + $0x2f0] sm:$0xff]  ;;  %v140_v36 = vld [vmem:[#allocation2 + $0x2c8] sm:$0xff] }
  0x3e   :  { %244 = vmatpush2.msra.mxu0 %v175_v2  ;;  %315 = vmatpush2.msra.mxu1 %v177_v3  ;;  %v142_v37 = vld [vmem:[#allocation2 + $0x2d8] sm:$0xff]  ;;  %v139_v39 = vld [vmem:[#allocation2 + $0x2c0] sm:$0xff]  ;;  %v141_v40 = vld [vmem:[#allocation2 + $0x2d0] sm:$0xff] }
  0x3f   :  { %245 = vmatprep.subr.mxu0 %v172_v4  ;;  %316 = vmatprep.subr.mxu1 %v174_v5  ;;  %v136_v41 = vld [vmem:[#allocation2 + $0x2a8] sm:$0xff]  ;;  %v138_v42 = vld [vmem:[#allocation2 + $0x2b8] sm:$0xff]  ;;  %v135_v43 = vld [vmem:[#allocation2 + $0x2a0] sm:$0xff] }
  0x40   :  { %246 = vmatpush2.msra.mxu0 %v171_v6  ;;  %317 = vmatpush2.msra.mxu1 %v173_v7  ;;  %v137_v44 = vld [vmem:[#allocation2 + $0x2b0] sm:$0xff]  ;;  %v132_v45 = vld [vmem:[#allocation2 + $0x288] sm:$0xff]  ;;  %v134_v46 = vld [vmem:[#allocation2 + $0x298] sm:$0xff] }
  0x41   :  { %247 = vmatprep.subr.mxu0 %v168_v8  ;;  %318 = vmatprep.subr.mxu1 %v170_v9  ;;  %v131_v48 = vld [vmem:[#allocation2 + $0x280] sm:$0xff]  ;;  %v133_v49 = vld [vmem:[#allocation2 + $0x290] sm:$0xff]  ;;  %v128_v50 = vld [vmem:[#allocation2 + $0x268] sm:$0xff] }
  0x42   :  { %248 = vmatpush2.msra.mxu0 %v167_v10  ;;  %319 = vmatpush2.msra.mxu1 %v169_v11  ;;  %v130_v51 = vld [vmem:[#allocation2 + $0x278] sm:$0xff]  ;;  %v127_v52 = vld [vmem:[#allocation2 + $0x260] sm:$0xff]  ;;  %v129_v53 = vld [vmem:[#allocation2 + $0x270] sm:$0xff] }
  0x43   :  { %249 = vmatprep.subr.mxu0 %v164_v12  ;;  %320 = vmatprep.subr.mxu1 %v166_v13  ;;  %v124_v54 = vld [vmem:[#allocation2 + $0x248] sm:$0xff]  ;;  %v126_v55 = vld [vmem:[#allocation2 + $0x258] sm:$0xff]  ;;  %v123_v57 = vld [vmem:[#allocation2 + $0x240] sm:$0xff] }
  0x44   :  { %250 = vmatpush2.msra.mxu0 %v163_v14  ;;  %321 = vmatpush2.msra.mxu1 %v165_v15  ;;  %v125_v58 = vld [vmem:[#allocation2 + $0x250] sm:$0xff]  ;;  %v50_v59 = vld [vmem:[%s767_s0] sm:$0x3]  ;;  %v120_v60 = vld [vmem:[#allocation2 + $0x228] sm:$0xff] }
  0x45   :  { %251 = vmatprep.subr.mxu0 %v160_v16  ;;  %322 = vmatprep.subr.mxu1 %v162_v17  ;;  %v122_v61 = vld [vmem:[#allocation2 + $0x238] sm:$0xff]  ;;  %v119_v63 = vld [vmem:[#allocation2 + $0x220] sm:$0xff]  ;;  %v121_v0 = vld [vmem:[#allocation2 + $0x230] sm:$0xff]  ;;  %v187_v3 = vrot.slane %v50_v59, %v186_v56  ;;  %v183_v5 = vrot.slane %v50_v59, %v182_v62 }
  0x46   :  { %252 = vmatpush2.msra.mxu0 %v159_v18  ;;  %323 = vmatpush2.msra.mxu1 %v161_v19  ;;  %v116_v1 = vld [vmem:[#allocation2 + $0x208] sm:$0xff]  ;;  %v118_v2 = vld [vmem:[#allocation2 + $0x218] sm:$0xff]  ;;  %v115_v4 = vld [vmem:[#allocation2 + $0x200] sm:$0xff] }
  0x47   :  { %253 = vmatprep.subr.mxu0 %v156_v20  ;;  %324 = vmatprep.subr.mxu1 %v158_v21  ;;  %v117_v6 = vld [vmem:[#allocation2 + $0x210] sm:$0xff]  ;;  %v388_v7 = vld [vmem:[#allocation4 + $0xf8] sm:$0xff]  ;;  %v386_v15 = vld [vmem:[#allocation4 + $0xe8] sm:$0xff] }
  0x48   :  { %254 = vmatpush2.msra.mxu0 %v155_v22  ;;  %325 = vmatpush2.msra.mxu1 %v157_v23  ;;  %v420_v8 = vld [vmem:[#allocation4 + $0x1f8] sm:$0xff]  ;;  %v387_v11 = vld [vmem:[#allocation4 + $0xf0] sm:$0xff]  ;;  %v418_v16 = vld [vmem:[#allocation4 + $0x1e8] sm:$0xff] }
  0x49   :  { %255 = vmatprep.subr.mxu0 %v152_v24  ;;  %326 = vmatprep.subr.mxu1 %v154_v25  ;;  %v372_v9 = vld [vmem:[#allocation4 + $0x78] sm:$0xff]  ;;  %v419_v12 = vld [vmem:[#allocation4 + $0x1f0] sm:$0xff]  ;;  %v370_v17 = vld [vmem:[#allocation4 + $0x68] sm:$0xff] }
  0x4a   :  { %256 = vmatpush2.msra.mxu0 %v151_v26  ;;  %327 = vmatpush2.msra.mxu1 %v153_v27  ;;  %v404_v10 = vld [vmem:[#allocation4 + $0x178] sm:$0xff]  ;;  %v371_v13 = vld [vmem:[#allocation4 + $0x70] sm:$0xff]  ;;  %v402_v18 = vld [vmem:[#allocation4 + $0x168] sm:$0xff] }
  0x4b   :  { %257 = vmatprep.subr.mxu0 %v148_v28  ;;  %328 = vmatprep.subr.mxu1 %v150_v29  ;;  %v403_v14 = vld [vmem:[#allocation4 + $0x170] sm:$0xff]  ;;  %v385_v19 = vld [vmem:[#allocation4 + $0xe0] sm:$0xff]  ;;  %v384_v23 = vld [vmem:[#allocation4 + $0xd8] sm:$0xff] }
  0x4c   :  { %258 = vmatpush2.msra.mxu0 %v147_v30  ;;  %329 = vmatpush2.msra.mxu1 %v149_v31  ;;  %v417_v20 = vld [vmem:[#allocation4 + $0x1e0] sm:$0xff]  ;;  %v416_v24 = vld [vmem:[#allocation4 + $0x1d8] sm:$0xff]  ;;  %v383_v27 = vld [vmem:[#allocation4 + $0xd0] sm:$0xff] }
  0x4d   :  { %259 = vmatprep.subr.mxu0 %v144_v32  ;;  %330 = vmatprep.subr.mxu1 %v146_v33  ;;  %v369_v21 = vld [vmem:[#allocation4 + $0x60] sm:$0xff]  ;;  %v368_v25 = vld [vmem:[#allocation4 + $0x58] sm:$0xff]  ;;  %v415_v28 = vld [vmem:[#allocation4 + $0x1d0] sm:$0xff] }
  0x4e   :  { %260 = vmatpush2.msra.mxu0 %v143_v34  ;;  %331 = vmatpush2.msra.mxu1 %v145_v35  ;;  %v401_v22 = vld [vmem:[#allocation4 + $0x160] sm:$0xff]  ;;  %v400_v26 = vld [vmem:[#allocation4 + $0x158] sm:$0xff]  ;;  %v367_v29 = vld [vmem:[#allocation4 + $0x50] sm:$0xff] }
  0x4f   :  { %261 = vmatprep.subr.mxu0 %v140_v36  ;;  %332 = vmatprep.subr.mxu1 %v142_v37  ;;  %v399_v30 = vld [vmem:[#allocation4 + $0x150] sm:$0xff]  ;;  %v382_v31 = vld [vmem:[#allocation4 + $0xc8] sm:$0xff]  ;;  %v381_v35 = vld [vmem:[#allocation4 + $0xc0] sm:$0xff] }
  0x50   :  { %262 = vmatpush2.msra.mxu0 %v139_v39  ;;  %333 = vmatpush2.msra.mxu1 %v141_v40  ;;  %v414_v32 = vld [vmem:[#allocation4 + $0x1c8] sm:$0xff]  ;;  %v413_v36 = vld [vmem:[#allocation4 + $0x1c0] sm:$0xff]  ;;  %v380_v39 = vld [vmem:[#allocation4 + $0xb8] sm:$0xff] }
  0x51   :  { %263 = vmatprep.subr.mxu0 %v136_v41  ;;  %334 = vmatprep.subr.mxu1 %v138_v42  ;;  %v366_v33 = vld [vmem:[#allocation4 + $0x48] sm:$0xff]  ;;  %v365_v37 = vld [vmem:[#allocation4 + $0x40] sm:$0xff]  ;;  %v412_v40 = vld [vmem:[#allocation4 + $0x1b8] sm:$0xff] }
  0x52   :  { %264 = vmatpush2.msra.mxu0 %v135_v43  ;;  %335 = vmatpush2.msra.mxu1 %v137_v44  ;;  %v398_v34 = vld [vmem:[#allocation4 + $0x148] sm:$0xff]  ;;  %v397_v38 = vld [vmem:[#allocation4 + $0x140] sm:$0xff]  ;;  %v364_v41 = vld [vmem:[#allocation4 + $0x38] sm:$0xff] }
  0x53   :  { %265 = vmatprep.subr.mxu0 %v132_v45  ;;  %336 = vmatprep.subr.mxu1 %v134_v46  ;;  %v396_v42 = vld [vmem:[#allocation4 + $0x138] sm:$0xff]  ;;  %v379_v43 = vld [vmem:[#allocation4 + $0xb0] sm:$0xff] }
  0x54   :  { %266 = vmatpush2.msra.mxu0 %v131_v48  ;;  %337 = vmatpush2.msra.mxu1 %v133_v49  ;;  %v411_v44 = vld [vmem:[#allocation4 + $0x1b0] sm:$0xff]  ;;  %v378_v48 = vld [vmem:[#allocation4 + $0xa8] sm:$0xff]  ;;  %v360_v59 = vld [vmem:[#allocation4 + $0x18] sm:$0xff] }
  0x55   :  { %267 = vmatprep.subr.mxu0 %v128_v50  ;;  %338 = vmatprep.subr.mxu1 %v130_v51  ;;  %v363_v45 = vld [vmem:[#allocation4 + $0x30] sm:$0xff]  ;;  %v410_v49 = vld [vmem:[#allocation4 + $0x1a8] sm:$0xff] }
  0x56   :  { %268 = vmatpush2.msra.mxu0 %v127_v52  ;;  %339 = vmatpush2.msra.mxu1 %v129_v53  ;;  %v395_v46 = vld [vmem:[#allocation4 + $0x130] sm:$0xff]  ;;  %v362_v50 = vld [vmem:[#allocation4 + $0x28] sm:$0xff]  ;;  %v377_v52 = vld [vmem:[#allocation4 + $0xa0] sm:$0xff] }
  0x57   :  { %269 = vmatprep.subr.mxu0 %v124_v54  ;;  %340 = vmatprep.subr.mxu1 %v126_v55  ;;  %v394_v51 = vld [vmem:[#allocation4 + $0x128] sm:$0xff]  ;;  %v409_v53 = vld [vmem:[#allocation4 + $0x1a0] sm:$0xff] }
  0x58   :  { %270 = vmatpush2.msra.mxu0 %v123_v57  ;;  %341 = vmatpush2.msra.mxu1 %v125_v58  ;;  %v361_v54 = vld [vmem:[#allocation4 + $0x20] sm:$0xff]  ;;  %v376_v57 = vld [vmem:[#allocation4 + $0x98] sm:$0xff] }
  0x59   :  { %271 = vmatprep.subr.mxu0 %v120_v60  ;;  %342 = vmatprep.subr.mxu1 %v122_v61  ;;  %v393_v55 = vld [vmem:[#allocation4 + $0x120] sm:$0xff]  ;;  %v408_v58 = vld [vmem:[#allocation4 + $0x198] sm:$0xff]  ;;  %v375_v61 = vld [vmem:[#allocation4 + $0x90] sm:$0xff] }
  0x5a   :  { %272 = vmatpush2.msra.mxu0 %v119_v63  ;;  %343 = vmatpush2.msra.mxu1 %v121_v0  ;;  %v392_v60 = vld [vmem:[#allocation4 + $0x118] sm:$0xff]  ;;  %v407_v63 = vld [vmem:[#allocation4 + $0x190] sm:$0xff] }
  0x5b   :  { %273 = vmatprep.subr.mxu0 %v116_v1  ;;  %344 = vmatprep.subr.mxu1 %v118_v2  ;;  %v359_v0 = vld [vmem:[#allocation4 + $0x10] sm:$0xff]  ;;  %v374_v2 = vld [vmem:[#allocation4 + $0x88] sm:$0xff] }
  0x5c   :  { %274 = vmatpush2.msra.mxu0 %v115_v4  ;;  %275 = vmatprep.mubr.f32.mxu0 %v187_v3  ;;  %v391_v1 = vld [vmem:[#allocation4 + $0x110] sm:$0xff]  ;;  %v358_v4 = vld [vmem:[#allocation4 + $0x8] sm:$0xff] }
  0x5d   :  { %345 = vmatpush2.msra.mxu1 %v117_v6  ;;  %346 = vmatprep.mubr.f32.mxu1 %v187_v3  ;;  %v406_v3 = vld [vmem:[#allocation4 + $0x188] sm:$0xff]  ;;  %v373_v6 = vld [vmem:[#allocation4 + $0x80] sm:$0xff] }
  0x5e   :  { %276 = vmatmul.mubr.f32.vlgmr.msra.gmra.mxu0 %v183_v5  ;;  %347 = vmatmul.mubr.f32.vlgmr.msra.gmra.mxu1 %v183_v5  ;;  %v390_v5 = vld [vmem:[#allocation4 + $0x108] sm:$0xff] }
  0x5f   :  { %569 = vmatprep.subr.mxu0 %v388_v7  ;;  %604 = vmatprep.subr.mxu1 %v420_v8  ;;  %v405_v7 = vld [vmem:[#allocation4 + $0x180] sm:$0xff] }
  0x60   :  { %570 = vmatpush3.msra.mxu0 %v372_v9  ;;  %605 = vmatpush3.msra.mxu1 %v404_v10  ;;  %v357_v8 = vld [vmem:[#allocation4] sm:$0xff]  ;;  %v201_v10 = vsub.s32 2, %v741_v47 }
  0x61   :  { %571 = vmatprep.subr.mxu0 %v387_v11  ;;  %606 = vmatprep.subr.mxu1 %v419_v12  ;;  %v389_v9 = vld [vmem:[#allocation4 + $0x100] sm:$0xff]  ;;  %v205_v12 = vsub.s32 3, %v741_v47 }
  0x62   :  { %572 = vmatpush3.msra.mxu0 %v371_v13  ;;  %607 = vmatpush3.msra.mxu1 %v403_v14  ;;  %v48_v11 = vld [vmem:[%s769_s2] sm:$0xf] }
  0x63   :  { %573 = vmatprep.subr.mxu0 %v386_v15  ;;  %608 = vmatprep.subr.mxu1 %v418_v16  ;;  %v194_v13 = vrot.slane %v48_v11, %v182_v62  ;;  %v202_v14 = vrot.slane %v48_v11, %v201_v10  ;;  %v198_v15 = vrot.slane %v48_v11, %v186_v56 }
  0x64   :  { %574 = vmatpush3.msra.mxu0 %v370_v17  ;;  %609 = vmatpush3.msra.mxu1 %v402_v18  ;;  %v206_v16 = vrot.slane %v48_v11, %v205_v12 }
  0x65   :  { %575 = vmatprep.subr.mxu0 %v385_v19  ;;  %610 = vmatprep.subr.mxu1 %v417_v20 }
  0x66   :  { %576 = vmatpush3.msra.mxu0 %v369_v21  ;;  %611 = vmatpush3.msra.mxu1 %v401_v22 }
  0x67   :  { %577 = vmatprep.subr.mxu0 %v384_v23  ;;  %612 = vmatprep.subr.mxu1 %v416_v24 }
  0x68   :  { %578 = vmatpush3.msra.mxu0 %v368_v25  ;;  %613 = vmatpush3.msra.mxu1 %v400_v26 }
  0x69   :  { %579 = vmatprep.subr.mxu0 %v383_v27  ;;  %614 = vmatprep.subr.mxu1 %v415_v28  ;;  %v49_v28 = vld [vmem:[%s771_s4] sm:$0x1] }
  0x6a   :  { %580 = vmatpush3.msra.mxu0 %v367_v29  ;;  %615 = vmatpush3.msra.mxu1 %v399_v30 }
  0x6b   :  { %581 = vmatprep.subr.mxu0 %v382_v31  ;;  %616 = vmatprep.subr.mxu1 %v414_v32 }
  0x6c   :  { %582 = vmatpush3.msra.mxu0 %v366_v33  ;;  %617 = vmatpush3.msra.mxu1 %v398_v34 }
  0x6d   :  { %583 = vmatprep.subr.mxu0 %v381_v35  ;;  %618 = vmatprep.subr.mxu1 %v413_v36 }
  0x6e   :  { %584 = vmatpush3.msra.mxu0 %v365_v37  ;;  %619 = vmatpush3.msra.mxu1 %v397_v38 }
  0x6f   :  { %585 = vmatprep.subr.mxu0 %v380_v39  ;;  %620 = vmatprep.subr.mxu1 %v412_v40 }
  0x70   :  { %586 = vmatpush3.msra.mxu0 %v364_v41  ;;  %621 = vmatpush3.msra.mxu1 %v396_v42 }
  0x71   :  { %587 = vmatprep.subr.mxu0 %v379_v43  ;;  %622 = vmatprep.subr.mxu1 %v411_v44 }
  0x72   :  { %588 = vmatpush3.msra.mxu0 %v363_v45  ;;  %623 = vmatpush3.msra.mxu1 %v395_v46 }
  0x73   :  { %589 = vmatprep.subr.mxu0 %v378_v48  ;;  %624 = vmatprep.subr.mxu1 %v410_v49 }
  0x74   :  { %590 = vmatpush3.msra.mxu0 %v362_v50  ;;  %625 = vmatpush3.msra.mxu1 %v394_v51 }
  0x75   :  { %591 = vmatprep.subr.mxu0 %v377_v52  ;;  %626 = vmatprep.subr.mxu1 %v409_v53 }
  0x76   :  { %592 = vmatpush3.msra.mxu0 %v361_v54  ;;  %627 = vmatpush3.msra.mxu1 %v393_v55 }
  0x77   :  { %593 = vmatprep.subr.mxu0 %v376_v57  ;;  %628 = vmatprep.subr.mxu1 %v408_v58 }
  0x78   :  { %594 = vmatpush3.msra.mxu0 %v360_v59  ;;  %629 = vmatpush3.msra.mxu1 %v392_v60 }
  0x79   :  { %595 = vmatprep.subr.mxu0 %v375_v61  ;;  %630 = vmatprep.subr.mxu1 %v407_v63 }
  0x7a   :  { %596 = vmatpush3.msra.mxu0 %v359_v0  ;;  %631 = vmatpush3.msra.mxu1 %v391_v1 }
  0x7b   :  { %597 = vmatprep.subr.mxu0 %v374_v2  ;;  %632 = vmatprep.subr.mxu1 %v406_v3 }
  0x7c   :  { %598 = vmatpush3.msra.mxu0 %v358_v4  ;;  %633 = vmatpush3.msra.mxu1 %v390_v5 }
  0x7d   :  { %599 = vmatprep.subr.mxu0 %v373_v6  ;;  %634 = vmatprep.subr.mxu1 %v405_v7 }
  0x7e   :  { %600 = vmatpush3.msra.mxu0 %v357_v8  ;;  %635 = vmatpush3.msra.mxu1 %v389_v9 }
 0x11e   :  { %v277_v17 = vpop.f32.mrf.mxu0  ;;  %v348_v18 = vpop.f32.mrf.mxu1 }
 0x11f   :  { %v278_v19 = vadd.f32 %v277_v17, %v194_v13  ;;  %v349_v20 = vadd.f32 %v348_v18, %v202_v14 }
 0x120   :  { %v279_v21 = vpop.f32.mrf.mxu0  ;;  %v350_v22 = vpop.f32.mrf.mxu1 }
 0x121   :  { %645 = vtanh.f32 %v278_v19  ;;  %v280_v23 = vadd.f32 %v279_v21, %v198_v15  ;;  %v351_v24 = vadd.f32 %v350_v22, %v206_v16 }
 0x122   :  { %647 = vtanh.f32 %v349_v20 }
 0x123   :  { %649 = vtanh.f32 %v280_v23 }
 0x124   :  { %651 = vtanh.f32 %v351_v24 }
 0x12e   :  { %v646_v25 = vpop.eup %645 }
 0x12f   :  { %v648_v26 = vpop.eup %647 }
 0x130   :  { %v650_v62 = vpop.eup %649 }
 0x131   :  { %v652_v27 = vpop.eup %651  ;;  %485 = vmatprep.mubr.f32.mxu0 %v650_v62 }
 0x132   :  { %555 = vmatprep.mubr.f32.mxu1 %v652_v27  ;;  %486 = vmatmul.mubr.f32.vlgmr.msra.gmra.mxu0 %v646_v25 }
 0x133   :  { %556 = vmatmul.mubr.f32.vlgmr.msra.gmra.mxu1 %v648_v26 }
 0x1f2   :  { %v601_v47 = vpop.f32.mrf.mxu0 }
 0x1f3   :  { %v636_v56 = vpop.f32.mrf.mxu1 }
 0x1f4   :  { %v602_v29 = vpop.f32.mrf.mxu0 }
 0x1f5   :  { %v603_v30 = vadd.f32 %v602_v29, %v601_v47  ;;  %v637_v31 = vpop.f32.mrf.mxu1 }
 0x1f6   :  { %v638_v33 = vadd.f32 %v637_v31, %v636_v56 }
 0x1f7   :  { %v488_v32 = vadd.f32 %v603_v30, %v49_v28 }
 0x1f9   :  { %v558_v34 = vadd.f32 %v638_v33, %v488_v32 }
 0x1fb   :  { %653 = vtanh.f32 %v558_v34 }
 0x208   :  { %v654_v35 = vpop.eup %653 }
 0x209   :  { %562 = vst [vmem:[%s772_s5] sm:$0x1] %v654_v35 }
 0x20a   :  { %567 = vsyncpa [#allocation3], 1 }
 0x20b   :  { %568 = vsyncpa [#allocation5], 1 }

</bundles_post_ra>
